<compile_context>
chip_gen: v7x
topology: tpu7x:2x2x1
jax: 0.10.0
libtpu: 0.0.40
codegen_flags: <defaults>
</compile_context>

<pallas_src>
import functools

import jax
import jax.numpy as jnp
from jax.experimental import pallas as pl
from jax.experimental.pallas import tpu as pltpu

EPS = 1e-5


# ------------------------------ small helpers -------------------------------


def _round_up(x, m):
    return ((x + m - 1) // m) * m


def _pad_to(a, shape):
    pads = [(0, s - d) for d, s in zip(a.shape, shape)]
    return jnp.pad(a, pads)


def _nbytes(shape, dtype):
    n = 1
    for s in shape:
        n *= int(s)
    return n * jnp.dtype(dtype).itemsize


# ------------------------------ fused kernel --------------------------------


def _make_fused_mlp_kernel(num_layers):
    """Whole-MLP kernel: activations never leave VMEM/vregs between layers.

    Ref order:
      inputs : x, [w_hbm, gamma, beta] * (num_layers-1), w_last_hbm, b_last
      outputs: o
      scratch: w_buf[0..num_layers-1] (bf16 VMEM), dma_sems (num_layers,)
    """
    num_hidden = num_layers - 1
    n_in = 1 + 3 * num_hidden + 2

    def kernel(*refs):
        x_ref = refs[0]
        o_ref = refs[n_in]
        w_bufs = refs[n_in + 1: n_in + 1 + num_layers]
        sems = refs[n_in + 1 + num_layers]

        # Unpack HBM weight refs and per-layer BN params.
        w_hbm, gammas, betas = [], [], []
        idx = 1
        for _ in range(num_hidden):
            w_hbm.append(refs[idx])
            gammas.append(refs[idx + 1])
            betas.append(refs[idx + 2])
            idx += 3
        w_hbm.append(refs[idx])
        b_last_ref = refs[idx + 1]

        # Kick off ALL weight DMAs up front; wait per-layer just before use so
        # later layers' weight fetch overlaps earlier layers' compute.
        copies = []
        for l in range(num_layers):
            cp = pltpu.make_async_copy(w_hbm[l], w_bufs[l], sems.at[l])
            cp.start()
            copies.append(cp)

        h = x_ref[...]                                     # (N, C_pad) f32
        for l in range(num_hidden):
            copies[l].wait()
            # bf16 x bf16 -> f32 on the MXU.
            y = jnp.dot(h.astype(jnp.bfloat16), w_bufs[l][...],
                        preferred_element_type=jnp.float32)

            # BatchNorm1d (training): two-pass batch stats, biased variance, f32.
            inv_n = 1.0 / y.shape[0]
            mean = jnp.sum(y, axis=0, keepdims=True) * inv_n
            centered = y - mean
            var = jnp.sum(centered * centered, axis=0, keepdims=True) * inv_n
            scale = jax.lax.rsqrt(var + EPS) * gammas[l][...]
            h = jnp.maximum(centered * scale + betas[l][...], 0.0)   # ReLU (f32)

        copies[num_layers - 1].wait()
        o_ref[...] = (
            jnp.dot(h.astype(jnp.bfloat16), w_bufs[num_layers - 1][...],
                    preferred_element_type=jnp.float32)
            + b_last_ref[...]
        )

    return kernel


# ------------------------------ dispatch wrapper -----------------------------


def mlp_forward(x, linears, batch_norms, *, num_layers, out_dim):
    """x: (N, C_in) f32. Params pre-padded to 128-lane multiples. -> (N, out_dim) f32."""
    n, c_in = x.shape
    c_in_pad = _round_up(c_in, 128)
    x_pad = _pad_to(x, (n, c_in_pad))

    vmem_spec = pl.BlockSpec(memory_space=pltpu.VMEM)
    any_spec = pl.BlockSpec(memory_space=pl.ANY)     # weights stay in HBM; manual DMA

    args = [x_pad]
    in_specs = [vmem_spec]
    w_shapes = []
    small_bytes = 0
    for layer in range(num_layers - 1):
        w_pad, _b_unused = linears[layer]            # hidden bias dropped: cancelled by BN mean
        g_pad, beta_pad = batch_norms[layer]
        args += [w_pad, g_pad, beta_pad]
        in_specs += [any_spec, vmem_spec, vmem_spec]
        w_shapes.append(w_pad.shape)
        small_bytes += _nbytes(g_pad.shape, g_pad.dtype) + _nbytes(beta_pad.shape, beta_pad.dtype)
    w_last, b_last = linears[num_layers - 1]
    args += [w_last, b_last]
    in_specs += [any_spec, vmem_spec]
    w_shapes.append(w_last.shape)
    small_bytes += _nbytes(b_last.shape, b_last.dtype)

    c_out_pad = w_last.shape[1]

    scratch_shapes = [pltpu.VMEM(s, jnp.bfloat16) for s in w_shapes]
    scratch_shapes.append(pltpu.SemaphoreType.DMA((num_layers,)))

    # VMEM budget: actual resident footprint (+2x / +4 MiB headroom for compiler
    # internals), capped at 3/4 of physical VMEM so v7x (64 MiB) keeps headroom.
    footprint = (
        _nbytes(x_pad.shape, jnp.float32)
        + _nbytes((n, c_out_pad), jnp.float32)
        + sum(_nbytes(s, jnp.bfloat16) for s in w_shapes)
        + small_bytes
    )
    try:
        phys_vmem = int(pltpu.get_tpu_info().vmem_capacity_bytes)
    except Exception:
        phys_vmem = 64 * 1024 * 1024
    vmem_limit = min(int(phys_vmem * 3 // 4),
                     max(16 * 1024 * 1024, 2 * footprint + 4 * 1024 * 1024))

    out_pad = pl.pallas_call(
        _make_fused_mlp_kernel(num_layers),
        out_shape=jax.ShapeDtypeStruct((n, c_out_pad), jnp.float32),
        in_specs=in_specs,
        out_specs=vmem_spec,
        scratch_shapes=scratch_shapes,
        compiler_params=pltpu.CompilerParams(vmem_limit_bytes=vmem_limit),
    )(*args)
    return out_pad[:, :out_dim]


# ------------------------------ parameter init ------------------------------


def init_mlp_params(key, in_channels, out_channels, embedding_dim, num_layers):
    """nn.Linear default init U(-1/sqrt(fan_in), +1/sqrt(fan_in)); stored padded.

    Weights: transposed vs PyTorch, (C_in_pad, C_out_pad), bfloat16 (MXU operands).
    Biases / gamma / beta: (1, C_pad) float32, zeros in padded lanes.
    """
    if num_layers == 1:
        dims = [(in_channels, out_channels)]
    else:
        dims = (
            [(in_channels, out_channels)]
            + [(out_channels, out_channels)] * (num_layers - 2)
            + [(out_channels, embedding_dim)]
        )

    linears = []
    for fan_in, fan_out in dims:
        key, kw, kb = jax.random.split(key, 3)
        bound = 1.0 / (fan_in ** 0.5)
        w = jax.random.uniform(kw, (fan_in, fan_out), jnp.float32, -bound, bound)
        b = jax.random.uniform(kb, (fan_out,), jnp.float32, -bound, bound)
        fi_pad, fo_pad = _round_up(fan_in, 128), _round_up(fan_out, 128)
        w_pad = _pad_to(w, (fi_pad, fo_pad)).astype(jnp.bfloat16)
        b_pad = _pad_to(b.reshape(1, -1), (1, fo_pad))
        linears.append((w_pad, b_pad))

    batch_norms = []
    hid_pad = _round_up(out_channels, 128)
    for _ in range(num_layers - 1):
        gamma = _pad_to(jnp.ones((1, out_channels), jnp.float32), (1, hid_pad))
        beta = jnp.zeros((1, hid_pad), jnp.float32)
        batch_norms.append((gamma, beta))
    return linears, batch_norms


# --------------------------- pure-JAX reference ------------------------------


def mlp_reference(x, linears, batch_norms, num_layers, in_channels,
                  out_channels, embedding_dim):
    """Unpadded reference with the same bf16 operand rounding as the kernel.

    Hidden-layer biases are re-added here to check they are exactly cancelled
    by the training-mode BatchNorm mean subtraction.
    """
    h = x
    for layer in range(num_layers - 1):
        w_pad, b_pad = linears[layer]
        fan_in = in_channels if layer == 0 else out_channels
        w = w_pad[:fan_in, :out_channels].astype(jnp.float32)      # bf16-rounded weights
        b = b_pad[0, :out_channels]
        h_q = h.astype(jnp.bfloat16).astype(jnp.float32)           # mirror in-kernel cast
        y = h_q @ w + b                                            # bias cancels under BN
        mean = jnp.mean(y, axis=0, keepdims=True)
        var = jnp.mean((y - mean) ** 2, axis=0, keepdims=True)
        y = (y - mean) / jnp.sqrt(var + EPS)
        h = jnp.maximum(y, 0.0)
    w_pad, b_pad = linears[num_layers - 1]
    fan_in = in_channels if num_layers == 1 else out_channels
    fan_out = out_channels if num_layers == 1 else embedding_dim
    w = w_pad[:fan_in, :fan_out].astype(jnp.float32)
    h_q = h.astype(jnp.bfloat16).astype(jnp.float32)
    return h_q @ w + b_pad[0, :fan_out]


# ---------------------------------- main -------------------------------------


if __name__ == "__main__":
    in_channels = 16
    out_channels = 32
    embedding_dim = 8
    num_layers = 3
    batch = 8

    key = jax.random.PRNGKey(0)
    key, kx = jax.random.split(key)
    x = jax.random.normal(kx, (batch, in_channels), jnp.float32)

    linears, batch_norms = init_mlp_params(
        key, in_channels, out_channels, embedding_dim, num_layers
    )

    out_dim = out_channels if num_layers == 1 else embedding_dim
    fwd = jax.jit(
        functools.partial(mlp_forward, num_layers=num_layers, out_dim=out_dim)
    )
    out = fwd(x, linears, batch_norms)
    jax.block_until_ready(out)
    assert out.shape == (batch, out_dim), out.shape

    ref = mlp_reference(
        x, linears, batch_norms, num_layers, in_channels, out_channels, embedding_dim
    )
    # bf16 matmul operands in both paths; remaining diff is f32 accumulation order.
    assert jnp.allclose(out, ref, atol=2e-3, rtol=2e-3), float(
        jnp.max(jnp.abs(out - ref))
    )

    print("KERNEL_OK")
</pallas_src>

<mosaic_0001>
module attributes {stable_mosaic.version = 11 : i64} {
  func.func @kernel(%arg0: memref<8x128xf32, #tpu.memory_space<vmem>>, %arg1: memref<128x128xbf16, #tpu.memory_space<any>>, %arg2: memref<1x128xf32, #tpu.memory_space<vmem>>, %arg3: memref<1x128xf32, #tpu.memory_space<vmem>>, %arg4: memref<128x128xbf16, #tpu.memory_space<any>>, %arg5: memref<1x128xf32, #tpu.memory_space<vmem>>, %arg6: memref<1x128xf32, #tpu.memory_space<vmem>>, %arg7: memref<128x128xbf16, #tpu.memory_space<any>>, %arg8: memref<1x128xf32, #tpu.memory_space<vmem>>, %arg9: memref<8x128xf32, #tpu.memory_space<vmem>>, %arg10: memref<128x128xbf16, #tpu.memory_space<vmem>>, %arg11: memref<128x128xbf16, #tpu.memory_space<vmem>>, %arg12: memref<128x128xbf16, #tpu.memory_space<vmem>>, %arg13: memref<3x!tpu.dma_semaphore, #tpu.memory_space<semaphore_mem>>) attributes {dimension_semantics = [], scalar_prefetch = 0 : i64, scratch_operands = 4 : i64, tpu.core_type = #tpu.core_type<tc>} {
    %c0_i32 = arith.constant 0 : i32
    %0 = tpu.memref_slice %arg13[%c0_i32] : memref<3x!tpu.dma_semaphore, #tpu.memory_space<semaphore_mem>> -> memref<1x!tpu.dma_semaphore, #tpu.memory_space<semaphore_mem>>
    %1 = tpu.memref_squeeze %0 : memref<1x!tpu.dma_semaphore, #tpu.memory_space<semaphore_mem>> -> memref<!tpu.dma_semaphore, #tpu.memory_space<semaphore_mem>>
    tpu.enqueue_dma source(%arg1 : memref<128x128xbf16, #tpu.memory_space<any>>) target(%arg10 : memref<128x128xbf16, #tpu.memory_space<vmem>>) target_semaphore(%1 : memref<!tpu.dma_semaphore, #tpu.memory_space<semaphore_mem>>)
    %c1_i32 = arith.constant 1 : i32
    %2 = tpu.memref_slice %arg13[%c1_i32] : memref<3x!tpu.dma_semaphore, #tpu.memory_space<semaphore_mem>> -> memref<1x!tpu.dma_semaphore, #tpu.memory_space<semaphore_mem>>
    %3 = tpu.memref_squeeze %2 : memref<1x!tpu.dma_semaphore, #tpu.memory_space<semaphore_mem>> -> memref<!tpu.dma_semaphore, #tpu.memory_space<semaphore_mem>>
    tpu.enqueue_dma source(%arg4 : memref<128x128xbf16, #tpu.memory_space<any>>) target(%arg11 : memref<128x128xbf16, #tpu.memory_space<vmem>>) target_semaphore(%3 : memref<!tpu.dma_semaphore, #tpu.memory_space<semaphore_mem>>)
    %c2_i32 = arith.constant 2 : i32
    %4 = tpu.memref_slice %arg13[%c2_i32] : memref<3x!tpu.dma_semaphore, #tpu.memory_space<semaphore_mem>> -> memref<1x!tpu.dma_semaphore, #tpu.memory_space<semaphore_mem>>
    %5 = tpu.memref_squeeze %4 : memref<1x!tpu.dma_semaphore, #tpu.memory_space<semaphore_mem>> -> memref<!tpu.dma_semaphore, #tpu.memory_space<semaphore_mem>>
    tpu.enqueue_dma source(%arg7 : memref<128x128xbf16, #tpu.memory_space<any>>) target(%arg12 : memref<128x128xbf16, #tpu.memory_space<vmem>>) target_semaphore(%5 : memref<!tpu.dma_semaphore, #tpu.memory_space<semaphore_mem>>)
    %c0 = arith.constant 0 : index
    %c0_0 = arith.constant 0 : index
    %6 = vector.load %arg0[%c0, %c0_0] : memref<8x128xf32, #tpu.memory_space<vmem>>, vector<8x128xf32>
    %c0_i32_1 = arith.constant 0 : i32
    %7 = tpu.memref_slice %arg13[%c0_i32_1] : memref<3x!tpu.dma_semaphore, #tpu.memory_space<semaphore_mem>> -> memref<1x!tpu.dma_semaphore, #tpu.memory_space<semaphore_mem>>
    %8 = tpu.memref_squeeze %7 : memref<1x!tpu.dma_semaphore, #tpu.memory_space<semaphore_mem>> -> memref<!tpu.dma_semaphore, #tpu.memory_space<semaphore_mem>>
    tpu.wait_dma2 semaphore(%8 : memref<!tpu.dma_semaphore, #tpu.memory_space<semaphore_mem>>) src(%arg1 : memref<128x128xbf16, #tpu.memory_space<any>>) dst(%arg10 : memref<128x128xbf16, #tpu.memory_space<vmem>>)
    %9 = arith.truncf %6 : vector<8x128xf32> to vector<8x128xbf16>
    %c0_2 = arith.constant 0 : index
    %c0_3 = arith.constant 0 : index
    %10 = vector.load %arg10[%c0_2, %c0_3] : memref<128x128xbf16, #tpu.memory_space<vmem>>, vector<128x128xbf16>
    %cst = arith.constant dense<0.000000e+00> : vector<8x128xf32>
    %11 = tpu.matmul %9, %10, %cst {dimension_numbers = #tpu.dot_dimension_numbers<[1], [0], [0], [1], [0, 0, 1, 1], [], []>} : vector<8x128xbf16>, vector<128x128xbf16>, vector<8x128xf32> -> vector<8x128xf32>
    %cst_4 = arith.constant dense<0.000000e+00> : vector<128xf32>
    %12 = vector.multi_reduction <add>, %11, %cst_4 [0] : vector<8x128xf32> to vector<128xf32>
    %13 = vector.shape_cast %12 : vector<128xf32> to vector<1x128xf32>
    %cst_5 = arith.constant 1.250000e-01 : f32
    %14 = vector.broadcast %cst_5 : f32 to vector<1x128xf32>
    %15 = arith.mulf %13, %14 : vector<1x128xf32>
    %16 = vector.broadcast %15 : vector<1x128xf32> to vector<8x128xf32>
    %17 = arith.subf %11, %16 : vector<8x128xf32>
    %18 = arith.mulf %17, %17 : vector<8x128xf32>
    %cst_6 = arith.constant dense<0.000000e+00> : vector<128xf32>
    %19 = vector.multi_reduction <add>, %18, %cst_6 [0] : vector<8x128xf32> to vector<128xf32>
    %20 = vector.shape_cast %19 : vector<128xf32> to vector<1x128xf32>
    %cst_7 = arith.constant 1.250000e-01 : f32
    %21 = vector.broadcast %cst_7 : f32 to vector<1x128xf32>
    %22 = arith.mulf %20, %21 : vector<1x128xf32>
    %cst_8 = arith.constant 9.99999974E-6 : f32
    %23 = vector.broadcast %cst_8 : f32 to vector<1x128xf32>
    %24 = arith.addf %22, %23 : vector<1x128xf32>
    %25 = math.rsqrt %24 : vector<1x128xf32>
    %c0_9 = arith.constant 0 : index
    %c0_10 = arith.constant 0 : index
    %26 = vector.load %arg2[%c0_9, %c0_10] : memref<1x128xf32, #tpu.memory_space<vmem>>, vector<1x128xf32>
    %27 = arith.mulf %25, %26 : vector<1x128xf32>
    %28 = vector.broadcast %27 : vector<1x128xf32> to vector<8x128xf32>
    %29 = arith.mulf %17, %28 : vector<8x128xf32>
    %c0_11 = arith.constant 0 : index
    %c0_12 = arith.constant 0 : index
    %30 = vector.load %arg3[%c0_11, %c0_12] : memref<1x128xf32, #tpu.memory_space<vmem>>, vector<1x128xf32>
    %31 = vector.broadcast %30 : vector<1x128xf32> to vector<8x128xf32>
    %32 = arith.addf %29, %31 : vector<8x128xf32>
    %cst_13 = arith.constant 0.000000e+00 : f32
    %33 = vector.broadcast %cst_13 : f32 to vector<8x128xf32>
    %34 = arith.maximumf %32, %33 : vector<8x128xf32>
    %c1_i32_14 = arith.constant 1 : i32
    %35 = tpu.memref_slice %arg13[%c1_i32_14] : memref<3x!tpu.dma_semaphore, #tpu.memory_space<semaphore_mem>> -> memref<1x!tpu.dma_semaphore, #tpu.memory_space<semaphore_mem>>
    %36 = tpu.memref_squeeze %35 : memref<1x!tpu.dma_semaphore, #tpu.memory_space<semaphore_mem>> -> memref<!tpu.dma_semaphore, #tpu.memory_space<semaphore_mem>>
    tpu.wait_dma2 semaphore(%36 : memref<!tpu.dma_semaphore, #tpu.memory_space<semaphore_mem>>) src(%arg4 : memref<128x128xbf16, #tpu.memory_space<any>>) dst(%arg11 : memref<128x128xbf16, #tpu.memory_space<vmem>>)
    %37 = arith.truncf %34 : vector<8x128xf32> to vector<8x128xbf16>
    %c0_15 = arith.constant 0 : index
    %c0_16 = arith.constant 0 : index
    %38 = vector.load %arg11[%c0_15, %c0_16] : memref<128x128xbf16, #tpu.memory_space<vmem>>, vector<128x128xbf16>
    %cst_17 = arith.constant dense<0.000000e+00> : vector<8x128xf32>
    %39 = tpu.matmul %37, %38, %cst_17 {dimension_numbers = #tpu.dot_dimension_numbers<[1], [0], [0], [1], [0, 0, 1, 1], [], []>} : vector<8x128xbf16>, vector<128x128xbf16>, vector<8x128xf32> -> vector<8x128xf32>
    %cst_18 = arith.constant dense<0.000000e+00> : vector<128xf32>
    %40 = vector.multi_reduction <add>, %39, %cst_18 [0] : vector<8x128xf32> to vector<128xf32>
    %41 = vector.shape_cast %40 : vector<128xf32> to vector<1x128xf32>
    %cst_19 = arith.constant 1.250000e-01 : f32
    %42 = vector.broadcast %cst_19 : f32 to vector<1x128xf32>
    %43 = arith.mulf %41, %42 : vector<1x128xf32>
    %44 = vector.broadcast %43 : vector<1x128xf32> to vector<8x128xf32>
    %45 = arith.subf %39, %44 : vector<8x128xf32>
    %46 = arith.mulf %45, %45 : vector<8x128xf32>
    %cst_20 = arith.constant dense<0.000000e+00> : vector<128xf32>
    %47 = vector.multi_reduction <add>, %46, %cst_20 [0] : vector<8x128xf32> to vector<128xf32>
    %48 = vector.shape_cast %47 : vector<128xf32> to vector<1x128xf32>
    %cst_21 = arith.constant 1.250000e-01 : f32
    %49 = vector.broadcast %cst_21 : f32 to vector<1x128xf32>
    %50 = arith.mulf %48, %49 : vector<1x128xf32>
    %cst_22 = arith.constant 9.99999974E-6 : f32
    %51 = vector.broadcast %cst_22 : f32 to vector<1x128xf32>
    %52 = arith.addf %50, %51 : vector<1x128xf32>
    %53 = math.rsqrt %52 : vector<1x128xf32>
    %c0_23 = arith.constant 0 : index
    %c0_24 = arith.constant 0 : index
    %54 = vector.load %arg5[%c0_23, %c0_24] : memref<1x128xf32, #tpu.memory_space<vmem>>, vector<1x128xf32>
    %55 = arith.mulf %53, %54 : vector<1x128xf32>
    %56 = vector.broadcast %55 : vector<1x128xf32> to vector<8x128xf32>
    %57 = arith.mulf %45, %56 : vector<8x128xf32>
    %c0_25 = arith.constant 0 : index
    %c0_26 = arith.constant 0 : index
    %58 = vector.load %arg6[%c0_25, %c0_26] : memref<1x128xf32, #tpu.memory_space<vmem>>, vector<1x128xf32>
    %59 = vector.broadcast %58 : vector<1x128xf32> to vector<8x128xf32>
    %60 = arith.addf %57, %59 : vector<8x128xf32>
    %cst_27 = arith.constant 0.000000e+00 : f32
    %61 = vector.broadcast %cst_27 : f32 to vector<8x128xf32>
    %62 = arith.maximumf %60, %61 : vector<8x128xf32>
    %c2_i32_28 = arith.constant 2 : i32
    %63 = tpu.memref_slice %arg13[%c2_i32_28] : memref<3x!tpu.dma_semaphore, #tpu.memory_space<semaphore_mem>> -> memref<1x!tpu.dma_semaphore, #tpu.memory_space<semaphore_mem>>
    %64 = tpu.memref_squeeze %63 : memref<1x!tpu.dma_semaphore, #tpu.memory_space<semaphore_mem>> -> memref<!tpu.dma_semaphore, #tpu.memory_space<semaphore_mem>>
    tpu.wait_dma2 semaphore(%64 : memref<!tpu.dma_semaphore, #tpu.memory_space<semaphore_mem>>) src(%arg7 : memref<128x128xbf16, #tpu.memory_space<any>>) dst(%arg12 : memref<128x128xbf16, #tpu.memory_space<vmem>>)
    %65 = arith.truncf %62 : vector<8x128xf32> to vector<8x128xbf16>
    %c0_29 = arith.constant 0 : index
    %c0_30 = arith.constant 0 : index
    %66 = vector.load %arg12[%c0_29, %c0_30] : memref<128x128xbf16, #tpu.memory_space<vmem>>, vector<128x128xbf16>
    %cst_31 = arith.constant dense<0.000000e+00> : vector<8x128xf32>
    %67 = tpu.matmul %65, %66, %cst_31 {dimension_numbers = #tpu.dot_dimension_numbers<[1], [0], [0], [1], [0, 0, 1, 1], [], []>} : vector<8x128xbf16>, vector<128x128xbf16>, vector<8x128xf32> -> vector<8x128xf32>
    %c0_32 = arith.constant 0 : index
    %c0_33 = arith.constant 0 : index
    %68 = vector.load %arg8[%c0_32, %c0_33] : memref<1x128xf32, #tpu.memory_space<vmem>>, vector<1x128xf32>
    %69 = vector.broadcast %68 : vector<1x128xf32> to vector<8x128xf32>
    %70 = arith.addf %67, %69 : vector<8x128xf32>
    %c0_34 = arith.constant 0 : index
    %c0_35 = arith.constant 0 : index
    %71 = vector.load %arg9[%c0_34, %c0_35] : memref<8x128xf32, #tpu.memory_space<vmem>>, vector<8x128xf32>
    tpu.vector_store %arg9[%c0_34, %c0_35], %70 {strides = array<i32>} : memref<8x128xf32, #tpu.memory_space<vmem>>, vector<8x128xf32>,
    return
  }
}

</mosaic_0001>

<bundles_post_ra>
// kernel: mlp_forward.1
= control target key start
LH: loop header
LB: loop body
LE: loop exit
PB: predicated region body
PF: predicated region fallthrough
CT: control target
= control target key end

     0   :  { %14 = vsyncpa [#allocation7], 0  ;;  %s528_s11 = smov [#allocation2]   ;;  %s529_s13 = smov [#allocation3]   ;;  %s687_s0 = inlined_call_operand.vmem [shape: f32[8,128], index: 0, kind: input, shape index: {}]   ;;  %s688_s1 = inlined_call_operand.hbm [shape: bf16[128,128], index: 1, kind: input, shape index: {}]   ;;  %s689_s2 = inlined_call_operand.vmem [shape: f32[1,128], index: 2, kind: input, shape index: {}]   ;;  %s690_s3 = inlined_call_operand.vmem [shape: f32[1,128], index: 3, kind: input, shape index: {}]   ;;  %s691_s4 = inlined_call_operand.hbm [shape: bf16[128,128], index: 4, kind: input, shape index: {}]   ;;  %s692_s5 = inlined_call_operand.vmem [shape: f32[1,128], index: 5, kind: input, shape index: {}]   ;;  %s693_s6 = inlined_call_operand.vmem [shape: f32[1,128], index: 6, kind: input, shape index: {}]   ;;  %s694_s7 = inlined_call_operand.hbm [shape: bf16[128,128], index: 7, kind: input, shape index: {}]   ;;  %s695_s8 = inlined_call_operand.vmem [shape: f32[1,128], index: 8, kind: input, shape index: {}]   ;;  %s696_s9 = inlined_call_operand.hbm [shape: f32[8,128], index: 9, kind: output, shape index: {}]  }
   0x1   :  { %v587_v0 = vld [vmem:[%s687_s0] sm:$0xff]  ;;  %s35_s12 = sshll.u32 %s528_s11, 4  ;;  %s47_s14 = sshll.u32 %s529_s13, 4  ;;  %s36_s12 = int_to_ptr.vmem [resolvable:$true] %s35_s12  ;;  %s48_s14 = int_to_ptr.vmem [resolvable:$true] %s47_s14 }
   0x2   :  { %s432_s17 = scalar_lea.hbm %s688_s1, 1024 }
   0x3   :  { %p433_p0 = scmp.ne.s32.totalorder %s688_s1, %s432_s17  ;;  %p436_p1 = scmp.lt.u32.totalorder %s432_s17, %s688_s1 }
   0x5   :  { %p438_p2 = pnand %p436_p1, %p433_p0 }
   0x7   :  { %441 = shalt.err (!%p438_p2)  }
   0x8   :  { %s442_s0 = scalar_lea.vmem %s36_s12, 1024  ;;  %p447_p4 = scmp.lt.s32.totalorder %s36_s12, %s36_s12 }
   0x9   :  { %p443_p3 = scmp.ne.s32.totalorder %s36_s12, %s442_s0  ;;  %p448_p5 = scmp.lt.s32.totalorder %s442_s0, %s442_s0 }
   0xb   :  { %p449_p6 = por %p448_p5, %p447_p4 }
   0xd   :  { %p450_p7 = pnand %p449_p6, %p443_p3 }
   0xf   :  { %453 = shalt.err (!%p450_p7)  }
  0x10   :  { %38 = dma.hbm_to_vmem [thread:$0]  %s688_s1, 1024, %s36_s12, [#allocation5] }
  0x11   :  { %s454_s26 = scalar_lea.hbm %s691_s4, 1024 }
  0x12   :  { %p455_p8 = scmp.ne.s32.totalorder %s691_s4, %s454_s26  ;;  %p458_p9 = scmp.lt.u32.totalorder %s454_s26, %s691_s4 }
  0x14   :  { %p460_p10 = pnand %p458_p9, %p455_p8 }
  0x16   :  { %463 = shalt.err (!%p460_p10)  }
  0x17   :  { %s464_s10 = scalar_lea.vmem %s48_s14, 1024  ;;  %p469_p12 = scmp.lt.s32.totalorder %s48_s14, %s48_s14 }
  0x18   :  { %p465_p11 = scmp.ne.s32.totalorder %s48_s14, %s464_s10  ;;  %p470_p13 = scmp.lt.s32.totalorder %s464_s10, %s464_s10 }
  0x1a   :  { %p471_p0 = por %p470_p13, %p469_p12 }
  0x1c   :  { %p472_p1 = pnand %p471_p0, %p465_p11 }
  0x1e   :  { %475 = shalt.err (!%p472_p1)  }
  0x1f   :  { %50 = dma.hbm_to_vmem [thread:$0]  %s691_s4, 1024, %s48_s14, [#allocation5 + $0x1] }
  0x20   :  { %s530_s12 = smov [#allocation4]   ;;  %s476_s17 = scalar_lea.hbm %s694_s7, 1024 }
  0x21   :  { %s59_s13 = sshll.u32 %s530_s12, 4  ;;  %p477_p2 = scmp.ne.s32.totalorder %s694_s7, %s476_s17  ;;  %s60_s13 = int_to_ptr.vmem [resolvable:$true] %s59_s13 }
  0x22   :  { %p480_p3 = scmp.lt.u32.totalorder %s476_s17, %s694_s7 }
  0x24   :  { %p482_p4 = pnand %p480_p3, %p477_p2 }
  0x26   :  { %485 = shalt.err (!%p482_p4)  }
  0x27   :  { %s486_s0 = scalar_lea.vmem %s60_s13, 1024  ;;  %p491_p6 = scmp.lt.s32.totalorder %s60_s13, %s60_s13 }
  0x28   :  { %p487_p5 = scmp.ne.s32.totalorder %s60_s13, %s486_s0  ;;  %p492_p7 = scmp.lt.s32.totalorder %s486_s0, %s486_s0 }
  0x2a   :  { %p493_p8 = por %p492_p7, %p491_p6 }
  0x2c   :  { %p494_p9 = pnand %p493_p8, %p487_p5 }
  0x2e   :  { %497 = shalt.err (!%p494_p9)  }
  0x2f   :  { %62 = dma.hbm_to_vmem [thread:$0]  %s694_s7, 1024, %s60_s13, [#allocation5 + $0x2] }
  0x30   :  { %520 = dma.done.wait [#allocation5], 1024 }
  0x31   :  { %521 = vsyncadd [#allocation5], 4294966272  ;;  %v531_v1 = vmov 0.0   ;;  %vm532_vm0 = vmmov 0   ;;  %v69_v2 = vld [vmem:[#allocation2] sm:$0xff]  ;;  %v70_v3 = vld [vmem:[#allocation2 + $0x8] sm:$0xff]  ;;  %v68_v10 = vpack.c.bf16 %v587_v0, %v587_v0  ;;  %v137_v32 = vlaneseq }
  0x32   :  { %362 = vmatprep.subr.bf16.mxu0 %v531_v1  ;;  %378 = vmatprep.mubr.msk.bf16.mxu0 %vm532_vm0, %v531_v1  ;;  %v71_v4 = vld [vmem:[#allocation2 + $0x10] sm:$0xff]  ;;  %v72_v5 = vld [vmem:[#allocation2 + $0x18] sm:$0xff]  ;;  %v73_v6 = vld [vmem:[#allocation2 + $0x20] sm:$0xff] }
  0x33   :  { %363 = vmatpush3.bf16.msra.mxu0 %v69_v2  ;;  %v74_v7 = vld [vmem:[#allocation2 + $0x28] sm:$0xff]  ;;  %v75_v8 = vld [vmem:[#allocation2 + $0x30] sm:$0xff]  ;;  %v76_v9 = vld [vmem:[#allocation2 + $0x38] sm:$0xff]  ;;  %v637_v33 = vshrl.u32 %v137_v32, 7 }
  0x34   :  { %364 = vmatprep.subr.bf16.mxu0 %v531_v1  ;;  %v135_v34 = vld [vmem:[%s689_s2] sm:$0x1] }
  0x35   :  { %v139_v35 = vsub.s32 0, %v637_v33  ;;  %v329_v39 = vld [vmem:[%s690_s3] ss:$0 sm:$0xff] }
  0x37   :  { %365 = vmatpush3.bf16.msra.mxu0 %v70_v3 }
  0x38   :  { %366 = vmatprep.subr.bf16.mxu0 %v531_v1 }
  0x3b   :  { %367 = vmatpush3.bf16.msra.mxu0 %v71_v4 }
  0x3c   :  { %368 = vmatprep.subr.bf16.mxu0 %v531_v1 }
  0x3f   :  { %369 = vmatpush3.bf16.msra.mxu0 %v72_v5 }
  0x40   :  { %370 = vmatprep.subr.bf16.mxu0 %v531_v1 }
  0x43   :  { %371 = vmatpush3.bf16.msra.mxu0 %v73_v6 }
  0x44   :  { %372 = vmatprep.subr.bf16.mxu0 %v531_v1 }
  0x47   :  { %373 = vmatpush3.bf16.msra.mxu0 %v74_v7 }
  0x48   :  { %374 = vmatprep.subr.bf16.mxu0 %v531_v1 }
  0x4b   :  { %375 = vmatpush3.bf16.msra.mxu0 %v75_v8 }
  0x4c   :  { %376 = vmatprep.subr.bf16.mxu0 %v531_v1 }
  0x4f   :  { %377 = vmatpush3.bf16.msra.mxu0 %v76_v9 }
  0x52   :  { %379 = vmatmul.mubr.bf16.vlgmr.msra.gmra.mrb[0].mxu0 %v68_v10 }
 0x125   :  { %v111_v11 = vpop.f32.mrb[0].mxu0 }
 0x126   :  { %v117_v12 = vrot.slane %v111_v11, 4  ;;  %v380_v13 = vpop.f32.mrb[1].mxu0 }
 0x127   :  { %v114_v14 = vpop.f32.mrb[2].mxu0 }
 0x128   :  { %v118_v15 = vadd.f32 %v117_v12, %v111_v11  ;;  %v381_v16 = vpop.f32.mrb[3].mxu0 }
 0x12a   :  { %v119_v17 = vrot.slane %v118_v15, 2 }
 0x12c   :  { %v120_v18 = vadd.f32 %v119_v17, %v118_v15 }
 0x12e   :  { %v121_v19 = vrot.slane %v120_v18, 1 }
 0x130   :  { %v122_v20 = vadd.f32 %v121_v19, %v120_v18 }
 0x132   :  { %v123_v21 = vmul.f32 0.125, %v122_v20 }
 0x134   :  { %v124_v22 = vsub.f32 %v111_v11, %v123_v21 }
 0x136   :  { %v125_v23 = vmul.f32 %v124_v22, %v124_v22 }
 0x138   :  { %v126_v24 = vrot.slane %v125_v23, 4 }
 0x13a   :  { %v127_v25 = vadd.f32 %v126_v24, %v125_v23 }
 0x13c   :  { %v128_v26 = vrot.slane %v127_v25, 2 }
 0x13e   :  { %v129_v27 = vadd.f32 %v128_v26, %v127_v25 }
 0x140   :  { %v130_v28 = vrot.slane %v129_v27, 1 }
 0x142   :  { %v131_v29 = vadd.f32 %v130_v28, %v129_v27 }
 0x144   :  { %v132_v30 = vmul.f32 0.125, %v131_v29 }
 0x146   :  { %v133_v31 = vadd.f32 1e-05, %v132_v30 }
 0x148   :  { %428 = vrsqrt.f32 %v133_v31 }
 0x152   :  { %v429_v36 = vpop.eup %428 }
 0x153   :  { %v136_v37 = vmul.f32 %v429_v36, %v135_v34 }
 0x155   :  { %v140_v38 = vrot.slane %v136_v37, %v139_v35 }
 0x157   :  { %v141_v40 = vmul.f32 %v140_v38, %v124_v22 }
 0x159   :  { %v149_v41 = vadd.f32 %v329_v39, %v141_v40 }
 0x15b   :  { %v150_v42 = vmax.f32 %v149_v41, 0.0 }
 0x15c   :  { %522 = dma.done.wait [#allocation5 + $0x1], 1024 }
 0x15d   :  { %523 = vsyncadd [#allocation5 + $0x1], 4294966272  ;;  %382 = vmatprep.subr.bf16.mxu1 %v531_v1  ;;  %398 = vmatprep.mubr.msk.bf16.mxu1 %vm532_vm0, %v531_v1  ;;  %v154_v43 = vld [vmem:[#allocation3] sm:$0xff]  ;;  %v155_v44 = vld [vmem:[#allocation3 + $0x8] sm:$0xff]  ;;  %v153_v51 = vpack.c.bf16 %v150_v42, %v150_v42 }
 0x15e   :  { %383 = vmatpush3.bf16.msra.mxu1 %v154_v43  ;;  %v156_v45 = vld [vmem:[#allocation3 + $0x10] sm:$0xff]  ;;  %v157_v46 = vld [vmem:[#allocation3 + $0x18] sm:$0xff]  ;;  %v158_v47 = vld [vmem:[#allocation3 + $0x20] sm:$0xff] }
 0x15f   :  { %384 = vmatprep.subr.bf16.mxu1 %v531_v1  ;;  %v159_v48 = vld [vmem:[#allocation3 + $0x28] sm:$0xff]  ;;  %v160_v49 = vld [vmem:[#allocation3 + $0x30] sm:$0xff]  ;;  %v161_v50 = vld [vmem:[#allocation3 + $0x38] sm:$0xff] }
 0x160   :  { %v220_v10 = vld [vmem:[%s692_s5] sm:$0x1] }
 0x161   :  { %v330_v14 = vld [vmem:[%s693_s6] ss:$0 sm:$0xff] }
 0x162   :  { %385 = vmatpush3.bf16.msra.mxu1 %v155_v44 }
 0x163   :  { %386 = vmatprep.subr.bf16.mxu1 %v531_v1 }
 0x166   :  { %387 = vmatpush3.bf16.msra.mxu1 %v156_v45 }
 0x167   :  { %388 = vmatprep.subr.bf16.mxu1 %v531_v1 }
 0x16a   :  { %389 = vmatpush3.bf16.msra.mxu1 %v157_v46 }
 0x16b   :  { %390 = vmatprep.subr.bf16.mxu1 %v531_v1 }
 0x16e   :  { %391 = vmatpush3.bf16.msra.mxu1 %v158_v47 }
 0x16f   :  { %392 = vmatprep.subr.bf16.mxu1 %v531_v1 }
 0x172   :  { %393 = vmatpush3.bf16.msra.mxu1 %v159_v48 }
 0x173   :  { %394 = vmatprep.subr.bf16.mxu1 %v531_v1 }
 0x176   :  { %395 = vmatpush3.bf16.msra.mxu1 %v160_v49 }
 0x177   :  { %396 = vmatprep.subr.bf16.mxu1 %v531_v1 }
 0x17a   :  { %397 = vmatpush3.bf16.msra.mxu1 %v161_v50 }
 0x17d   :  { %399 = vmatmul.mubr.bf16.vlgmr.msra.gmra.mrb[0].mxu1 %v153_v51 }
 0x250   :  { %v196_v52 = vpop.f32.mrb[0].mxu1 }
 0x251   :  { %v202_v53 = vrot.slane %v196_v52, 4  ;;  %v400_v54 = vpop.f32.mrb[1].mxu1 }
 0x252   :  { %v199_v55 = vpop.f32.mrb[2].mxu1 }
 0x253   :  { %v203_v56 = vadd.f32 %v202_v53, %v196_v52  ;;  %v401_v57 = vpop.f32.mrb[3].mxu1 }
 0x255   :  { %v204_v58 = vrot.slane %v203_v56, 2 }
 0x257   :  { %v205_v59 = vadd.f32 %v204_v58, %v203_v56 }
 0x259   :  { %v206_v60 = vrot.slane %v205_v59, 1 }
 0x25b   :  { %v207_v61 = vadd.f32 %v206_v60, %v205_v59 }
 0x25d   :  { %v208_v62 = vmul.f32 0.125, %v207_v61 }
 0x25f   :  { %v209_v63 = vsub.f32 %v196_v52, %v208_v62 }
 0x261   :  { %v210_v0 = vmul.f32 %v209_v63, %v209_v63 }
 0x263   :  { %v211_v2 = vrot.slane %v210_v0, 4 }
 0x265   :  { %v212_v3 = vadd.f32 %v211_v2, %v210_v0 }
 0x267   :  { %v213_v4 = vrot.slane %v212_v3, 2 }
 0x269   :  { %v214_v5 = vadd.f32 %v213_v4, %v212_v3 }
 0x26b   :  { %v215_v6 = vrot.slane %v214_v5, 1 }
 0x26d   :  { %v216_v7 = vadd.f32 %v215_v6, %v214_v5 }
 0x26f   :  { %v217_v8 = vmul.f32 0.125, %v216_v7 }
 0x271   :  { %v218_v9 = vadd.f32 1e-05, %v217_v8 }
 0x273   :  { %430 = vrsqrt.f32 %v218_v9 }
 0x27d   :  { %v431_v11 = vpop.eup %430 }
 0x27e   :  { %v221_v12 = vmul.f32 %v431_v11, %v220_v10 }
 0x280   :  { %v225_v13 = vrot.slane %v221_v12, %v139_v35 }
 0x282   :  { %v226_v15 = vmul.f32 %v225_v13, %v209_v63 }
 0x284   :  { %v234_v16 = vadd.f32 %v330_v14, %v226_v15 }
 0x286   :  { %v235_v17 = vmax.f32 %v234_v16, 0.0 }
 0x287   :  { %524 = dma.done.wait [#allocation5 + $0x2], 1024 }
 0x288   :  { %525 = vsyncadd [#allocation5 + $0x2], 4294966272  ;;  %402 = vmatprep.subr.bf16.mxu0 %v531_v1  ;;  %418 = vmatprep.mubr.msk.bf16.mxu0 %vm532_vm0, %v531_v1  ;;  %v239_v18 = vld [vmem:[#allocation4] sm:$0xff]  ;;  %v240_v19 = vld [vmem:[#allocation4 + $0x8] sm:$0xff]  ;;  %v238_v26 = vpack.c.bf16 %v235_v17, %v235_v17  ;;  %s533_s27 = smov [#allocation6]  }
 0x289   :  { %403 = vmatpush3.bf16.msra.mxu0 %v239_v18  ;;  %v241_v20 = vld [vmem:[#allocation4 + $0x10] sm:$0xff]  ;;  %v242_v21 = vld [vmem:[#allocation4 + $0x18] sm:$0xff]  ;;  %v243_v22 = vld [vmem:[#allocation4 + $0x20] sm:$0xff]  ;;  %s301_s28 = sshll.u32 %s533_s27, 4  ;;  %s302_s28 = int_to_ptr.vmem [resolvable:$true] %s301_s28 }
 0x28a   :  { %404 = vmatprep.subr.bf16.mxu0 %v531_v1  ;;  %v244_v23 = vld [vmem:[#allocation4 + $0x28] sm:$0xff]  ;;  %v245_v24 = vld [vmem:[#allocation4 + $0x30] sm:$0xff]  ;;  %v246_v25 = vld [vmem:[#allocation4 + $0x38] sm:$0xff]  ;;  %s498_s29 = scalar_lea.vmem %s302_s28, 128  ;;  %p503_p11 = scmp.lt.s32.totalorder %s302_s28, %s302_s28 }
 0x28b   :  { %v331_v27 = vld [vmem:[%s695_s8] ss:$0 sm:$0xff]  ;;  %p499_p10 = scmp.ne.s32.totalorder %s302_s28, %s498_s29  ;;  %p504_p12 = scmp.lt.s32.totalorder %s498_s29, %s498_s29 }
 0x28d   :  { %405 = vmatpush3.bf16.msra.mxu0 %v240_v19  ;;  %p505_p13 = por %p504_p12, %p503_p11 }
 0x28e   :  { %406 = vmatprep.subr.bf16.mxu0 %v531_v1 }
 0x28f   :  { %p506_p0 = pnand %p505_p13, %p499_p10 }
 0x291   :  { %407 = vmatpush3.bf16.msra.mxu0 %v241_v20 }
 0x292   :  { %408 = vmatprep.subr.bf16.mxu0 %v531_v1 }
 0x295   :  { %409 = vmatpush3.bf16.msra.mxu0 %v242_v21 }
 0x296   :  { %410 = vmatprep.subr.bf16.mxu0 %v531_v1 }
 0x299   :  { %411 = vmatpush3.bf16.msra.mxu0 %v243_v22 }
 0x29a   :  { %412 = vmatprep.subr.bf16.mxu0 %v531_v1 }
 0x29d   :  { %413 = vmatpush3.bf16.msra.mxu0 %v244_v23 }
 0x29e   :  { %414 = vmatprep.subr.bf16.mxu0 %v531_v1 }
 0x2a1   :  { %415 = vmatpush3.bf16.msra.mxu0 %v245_v24 }
 0x2a2   :  { %416 = vmatprep.subr.bf16.mxu0 %v531_v1 }
 0x2a5   :  { %417 = vmatpush3.bf16.msra.mxu0 %v246_v25 }
 0x2a8   :  { %419 = vmatmul.mubr.bf16.vlgmr.msra.gmra.mrb[4].mxu0 %v238_v26 }
 0x37b   :  { %v288_v28 = vpop.f32.mrb[4].mxu0 }
 0x37c   :  { %v289_v29 = vadd.f32 %v331_v27, %v288_v28  ;;  %v420_v30 = vpop.f32.mrb[5].mxu0 }
 0x37d   :  { %v291_v31 = vpop.f32.mrb[6].mxu0 }
 0x37e   :  { %294 = vst [vmem:[#allocation6] sm:$0xff] %v289_v29  ;;  %v421_v32 = vpop.f32.mrb[7].mxu0 }
 0x37f   :  { %509 = shalt.err (!%p506_p0)
}
 0x380   :  { %s510_s8 = scalar_lea.hbm %s696_s9, 128 }
 0x381   :  { %p511_p1 = scmp.ne.s32.totalorder %s696_s9, %s510_s8  ;;  %p514_p2 = scmp.lt.u32.totalorder %s510_s8, %s696_s9 }
 0x383   :  { %p516_p3 = pnand %p514_p2, %p511_p1 }
 0x385   :  { %519 = shalt.err (!%p516_p3)
}
 0x386   :  { %304 = dma.vmem_to_hbm [thread:$0]  %s302_s28, 128, %s696_s9, [#allocation7]  }
 0x387   :  { %526 = dma.done.wait [#allocation7], 128  }
 0x388   :  { %527 = vsyncadd [#allocation7], 4294967168 }
 0x389   :  { %308 = vsyncpa [#allocation7], 1 }
 0x38a   :  { %309 = vsyncmov [#allocation5] }
 0x38d   :  { %s310_s17 = vpop.sfrf %309 }
 0x38e   :  { %p332_p4 = scmp.ne.s32.totalorder %s310_s17, 0 }
 0x390   :  { %314 = shalt.err (%p332_p4)  }
 0x391   :  { %316 = vsyncmov [#allocation5 + $0x1] }
 0x394   :  { %s317_s18 = vpop.sfrf %316 }
 0x395   :  { %p333_p5 = scmp.ne.s32.totalorder %s317_s18, 0 }
 0x397   :  { %321 = shalt.err (%p333_p5)  }
 0x398   :  { %323 = vsyncmov [#allocation5 + $0x2] }
 0x39b   :  { %s324_s19 = vpop.sfrf %323 }
 0x39c   :  { %p334_p6 = scmp.ne.s32.totalorder %s324_s19, 0 }
 0x39e   :  { %328 = shalt.err (%p334_p6)  }

</bundles_post_ra>
